<compile_context>
chip_gen: v7x
topology: tpu7x:2x2x1
jax: 0.10.0
libtpu: 0.0.40
codegen_flags: <defaults>
</compile_context>

<pallas_src>
import functools

import jax
import jax.numpy as jnp
from jax import lax
from jax.experimental import pallas as pl
from jax.experimental.pallas import tpu as pltpu


def _vmem_capacity_bytes() -> int:
    """Hardware-derived VMEM capacity (128 MiB on v5e/v6e, 64 MiB/TC on v7x)."""
    try:
        return int(pltpu.get_tpu_info().vmem_capacity_bytes)
    except Exception:
        return 64 * 1024 * 1024  # conservative fallback


def _pick_tile_hw(hw: int, max_tile: int = 512):
    """Largest multiple-of-128 divisor of hw, capped at `max_tile` lanes.

    Exact divisibility is required: padded lanes would corrupt the avg/max
    pools (sigmoid(0) = 0.5 would leak into the sum / max).
    """
    best = None
    t = 128
    while t <= min(hw, max_tile):
        if hw % t == 0:
            best = t
        t += 128
    return best


# -----------------------------------------------------------------------------
# Fused single-pass kernel: one (C, HW) slab per grid step (1 read + 1 write).
# -----------------------------------------------------------------------------
def _sam_fused_kernel(w_ref, x_ref, o_ref, *, inv_hw: float):
    """w_ref: (1, C) conv weight row; x_ref/o_ref: (C, HW) per-batch slab."""
    x = x_ref[...]                                   # native dtype, no upcast
    w = w_ref[...].astype(x.dtype)                   # (1, C) lane-dense

    # 1x1 conv C -> 1 on the MXU; accumulation stays in f32 inside the MXU.
    chan_lin = jnp.dot(w, x, preferred_element_type=jnp.float32,
                       precision=lax.Precision.HIGHEST)        # (1, HW)
    chan_att = jax.nn.sigmoid(chan_lin)                        # (1, HW) f32

    # AdaptiveAvgPool2d(1) / AdaptiveMaxPool2d(1) over the spatial lane axis.
    avg_att = jnp.sum(chan_att, axis=1, keepdims=True) * inv_hw     # (1, 1)
    max_att = jnp.max(chan_att, axis=1, keepdims=True)              # (1, 1)

    # x * channel_attention * spatial_attention, applied in native dtype.
    scale = (chan_att * (avg_att + max_att)).astype(o_ref.dtype)    # (1, HW)
    o_ref[...] = x * scale


def _sam_fused(x_flat, w_row, working_set, vmem_cap):
    b, c, hw = x_flat.shape
    kernel = functools.partial(_sam_fused_kernel, inv_hw=1.0 / float(hw))
    vmem_limit = min(int(0.9 * vmem_cap),
                     max(working_set + (4 << 20), 16 << 20))
    return pl.pallas_call(
        kernel,
        out_shape=jax.ShapeDtypeStruct((b, c, hw), x_flat.dtype),
        grid_spec=pltpu.PrefetchScalarGridSpec(
            num_scalar_prefetch=0,
            grid=(b,),
            in_specs=[
                # Tiny lane-dense weight row, replicated to every grid step.
                pl.BlockSpec((1, c), lambda i: (0, 0)),
                # Per-batch input slab; batch dim squeezed out of the kernel.
                pl.BlockSpec((pl.Squeezed(), c, hw), lambda i: (i, 0, 0)),
            ],
            out_specs=pl.BlockSpec((pl.Squeezed(), c, hw), lambda i: (i, 0, 0)),
        ),
        compiler_params=pltpu.CompilerParams(
            dimension_semantics=("parallel",),
            vmem_limit_bytes=vmem_limit,
        ),
    )(w_row, x_flat)


# -----------------------------------------------------------------------------
# Two-pass tiled fallback for slabs that do not fit the fused VMEM budget.
# -----------------------------------------------------------------------------
def _sam_attention_kernel(w_ref, x_ref, ca_ref, sp_ref, sum_sc, max_sc, *,
                          inv_hw: float):
    """Pass 1: per-tile channel attention + running avg/max pool accumulators.

    w_ref:  (1, C) weight row.
    x_ref:  (C, tile_hw) input tile.
    ca_ref: (1, tile_hw) channel-attention tile (f32).
    sp_ref: (1, 1) spatial attention (avg + max), resident across the HW axis.
    """
    j = pl.program_id(1)

    @pl.when(j == 0)
    def _():
        sum_sc[...] = jnp.zeros_like(sum_sc)
        max_sc[...] = jnp.full_like(max_sc, -jnp.inf)

    x = x_ref[...]
    w = w_ref[...].astype(x.dtype)
    chan_lin = jnp.dot(w, x, preferred_element_type=jnp.float32,
                       precision=lax.Precision.HIGHEST)        # (1, tile_hw)
    chan_att = jax.nn.sigmoid(chan_lin)

    sum_sc[...] = sum_sc[...] + jnp.sum(chan_att, axis=1, keepdims=True)
    max_sc[...] = jnp.maximum(max_sc[...],
                              jnp.max(chan_att, axis=1, keepdims=True))

    ca_ref[...] = chan_att.astype(ca_ref.dtype)
    # Running value; the last HW step holds the final spatial attention.
    sp_ref[...] = sum_sc[...] * inv_hw + max_sc[...]


def _sam_apply_kernel(ca_ref, sp_ref, x_ref, o_ref):
    """Pass 2: out = x * chan_att * spatial_att on one (C, tile_hw) tile."""
    scale = (ca_ref[...] * sp_ref[...]).astype(o_ref.dtype)    # (1, tile_hw)
    o_ref[...] = x_ref[...] * scale


def _sam_two_pass(x_flat, w_row, tile_hw, vmem_cap):
    b, c, hw = x_flat.shape
    n_hw = hw // tile_hw
    itemsize = x_flat.dtype.itemsize
    # Per-step working set: x (+ out) tiles double-buffered plus small rows.
    vmem_limit = min(int(0.9 * vmem_cap),
                     max(8 * c * tile_hw * itemsize + (4 << 20), 16 << 20))

    # Pass 1: channel attention tiles + global spatial attention.
    chan_att, spatial_att = pl.pallas_call(
        functools.partial(_sam_attention_kernel, inv_hw=1.0 / float(hw)),
        out_shape=(
            jax.ShapeDtypeStruct((b, 1, hw), jnp.float32),
            jax.ShapeDtypeStruct((b, 1, 1), jnp.float32),
        ),
        grid_spec=pltpu.PrefetchScalarGridSpec(
            num_scalar_prefetch=0,
            grid=(b, n_hw),
            in_specs=[
                pl.BlockSpec((1, c), lambda i, j: (0, 0)),
                pl.BlockSpec((pl.Squeezed(), c, tile_hw),
                             lambda i, j: (i, 0, j)),
            ],
            out_specs=[
                pl.BlockSpec((pl.Squeezed(), 1, tile_hw),
                             lambda i, j: (i, 0, j)),
                pl.BlockSpec((pl.Squeezed(), 1, 1), lambda i, j: (i, 0, 0)),
            ],
            scratch_shapes=[
                pltpu.VMEM((1, 1), jnp.float32),   # running sum for avg pool
                pltpu.VMEM((1, 1), jnp.float32),   # running max for max pool
            ],
        ),
        compiler_params=pltpu.CompilerParams(
            dimension_semantics=("parallel", "arbitrary"),
            vmem_limit_bytes=vmem_limit,
        ),
    )(w_row, x_flat)

    # Pass 2: fully parallel elementwise apply (streams lane-dense tiles).
    out_flat = pl.pallas_call(
        _sam_apply_kernel,
        out_shape=jax.ShapeDtypeStruct((b, c, hw), x_flat.dtype),
        grid_spec=pltpu.PrefetchScalarGridSpec(
            num_scalar_prefetch=0,
            grid=(b, n_hw),
            in_specs=[
                pl.BlockSpec((pl.Squeezed(), 1, tile_hw),
                             lambda i, j: (i, 0, j)),
                pl.BlockSpec((pl.Squeezed(), 1, 1), lambda i, j: (i, 0, 0)),
                pl.BlockSpec((pl.Squeezed(), c, tile_hw),
                             lambda i, j: (i, 0, j)),
            ],
            out_specs=pl.BlockSpec((pl.Squeezed(), c, tile_hw),
                                   lambda i, j: (i, 0, j)),
        ),
        compiler_params=pltpu.CompilerParams(
            dimension_semantics=("parallel", "parallel"),
            vmem_limit_bytes=vmem_limit,
        ),
    )(chan_att, spatial_att, x_flat)
    return out_flat


# -----------------------------------------------------------------------------
# Public wrapper.
# -----------------------------------------------------------------------------
def sam_forward(x: jax.Array, conv_weight: jax.Array, *,
                force_two_pass: bool = False) -> jax.Array:
    """Pallas SAM forward. x is NCHW, conv_weight is (1, C, 1, 1)."""
    b, c, h, w = x.shape
    assert conv_weight.shape == (1, c, 1, 1), "conv1 weight must be (1, C, 1, 1)"
    hw = h * w

    # Lane-dense layout: spatial dims on the lane axis, channels on sublanes.
    x_flat = x.reshape(b, c, hw)
    w_row = conv_weight.reshape(1, c)

    vmem_cap = _vmem_capacity_bytes()
    slab_bytes = c * hw * x.dtype.itemsize
    fused_working_set = 4 * slab_bytes            # in + out, double-buffered
    fused_budget = int(0.4 * vmem_cap)            # ~25 MiB on v7x, ~51 MiB v6e

    use_two_pass = force_two_pass or (fused_working_set > fused_budget)
    tile_hw = _pick_tile_hw(hw)
    if use_two_pass and tile_hw is None:
        # No multiple-of-128 divisor of HW: padded lanes would corrupt the
        # pools, so stay on the fused path for these (typically small) maps.
        use_two_pass = False

    if use_two_pass:
        out_flat = _sam_two_pass(x_flat, w_row, tile_hw, vmem_cap)
    else:
        out_flat = _sam_fused(x_flat, w_row, fused_working_set, vmem_cap)
    return out_flat.reshape(b, c, h, w)


def sam_ref(x: jax.Array, conv_weight: jax.Array) -> jax.Array:
    """Pure-JAX reference matching the PyTorch SAM.forward exactly."""
    wv = conv_weight.reshape(-1)                                  # (C,)
    chan_lin = jnp.einsum("bchw,c->bhw", x, wv)[:, None, :, :]    # (B,1,H,W)
    chan_att = jax.nn.sigmoid(chan_lin)
    avg_att = jnp.mean(chan_att, axis=(2, 3), keepdims=True)      # (B,1,1,1)
    max_att = jnp.max(chan_att, axis=(2, 3), keepdims=True)       # (B,1,1,1)
    return x * chan_att * (avg_att + max_att)


if __name__ == "__main__":
    key = jax.random.PRNGKey(0)
    kx, kw_ = jax.random.split(key)

    B, C, H, W = 2, 4, 16, 16
    x = jax.random.normal(kx, (B, C, H, W), dtype=jnp.float32)
    conv_w = 0.1 * jax.random.normal(kw_, (1, C, 1, 1), dtype=jnp.float32)

    ref = sam_ref(x, conv_w)
    out = jax.block_until_ready(sam_forward(x, conv_w))
    assert out.shape == ref.shape and out.dtype == ref.dtype
    assert jnp.allclose(out, ref, rtol=1e-4, atol=1e-5), "fused SAM mismatch"

    # Also exercise the two-pass tiled fallback (auto-selected for feature maps
    # whose per-batch slab exceeds the VMEM budget); HW=1024 -> 2 x 512-lane tiles.
    kx2, kw2 = jax.random.split(jax.random.PRNGKey(1))
    x2 = jax.random.normal(kx2, (2, 8, 32, 32), dtype=jnp.float32)
    conv_w2 = 0.1 * jax.random.normal(kw2, (1, 8, 1, 1), dtype=jnp.float32)
    out2 = jax.block_until_ready(sam_forward(x2, conv_w2, force_two_pass=True))
    ref2 = sam_ref(x2, conv_w2)
    assert jnp.allclose(out2, ref2, rtol=1e-4, atol=1e-5), "two-pass SAM mismatch"

    print("KERNEL_OK")
</pallas_src>

<mosaic_0001>
module attributes {stable_mosaic.version = 11 : i64} {
  func.func @_sam_fused_kernel(%arg0: i32, %arg1: memref<1x4xf32, #tpu.memory_space<vmem>>, %arg2: memref<1x4x256xf32, #tpu.memory_space<vmem>>, %arg3: memref<1x4x256xf32, #tpu.memory_space<vmem>>) attributes {dimension_semantics = [#tpu.dimension_semantics<parallel>], iteration_bounds = array<i64: 2>, scalar_prefetch = 0 : i64, scratch_operands = 0 : i64, tpu.core_type = #tpu.core_type<tc>, window_params = [{pipeline_mode = #tpu.pipeline_mode<synchronous>, transform_indices = @transform_0, window_bounds = array<i64: 1, 4>}, {transform_indices = @transform_1, window_bounds = array<i64: 1, 4, 256>}, {transform_indices = @transform_2, window_bounds = array<i64: 1, 4, 256>}]} {
    %c0 = arith.constant 0 : index
    %c0_0 = arith.constant 0 : index
    %c0_1 = arith.constant 0 : index
    %0 = vector.load %arg2[%c0, %c0_0, %c0_1] : memref<1x4x256xf32, #tpu.memory_space<vmem>>, vector<1x4x256xf32>
    %1 = vector.shape_cast %0 : vector<1x4x256xf32> to vector<4x256xf32>
    %c0_2 = arith.constant 0 : index
    %c0_3 = arith.constant 0 : index
    %2 = vector.load %arg1[%c0_2, %c0_3] : memref<1x4xf32, #tpu.memory_space<vmem>>, vector<1x4xf32>
    %cst = arith.constant dense<0.000000e+00> : vector<1x256xf32>
    %3 = tpu.matmul %2, %1, %cst {dimension_numbers = #tpu.dot_dimension_numbers<[1], [0], [0], [1], [0, 0, 1, 1], [], []>, precision = #tpu.contract_precision<fp32>} : vector<1x4xf32>, vector<4x256xf32>, vector<1x256xf32> -> vector<1x256xf32>
    %4 = arith.negf %3 : vector<1x256xf32>
    %5 = math.exp %4 : vector<1x256xf32>
    %cst_4 = arith.constant 1.000000e+00 : f32
    %6 = vector.broadcast %cst_4 : f32 to vector<1x256xf32>
    %7 = arith.addf %6, %5 : vector<1x256xf32>
    %8 = arith.divf %6, %7 : vector<1x256xf32>
    %cst_5 = arith.constant dense<0.000000e+00> : vector<1xf32>
    %9 = vector.multi_reduction <add>, %8, %cst_5 [1] : vector<1x256xf32> to vector<1xf32>
    %10 = vector.shape_cast %9 : vector<1xf32> to vector<1x1xf32>
    %cst_6 = arith.constant 3.906250e-03 : f32
    %11 = vector.broadcast %cst_6 : f32 to vector<1x1xf32>
    %12 = arith.mulf %10, %11 : vector<1x1xf32>
    %cst_7 = arith.constant dense<0xFF800000> : vector<1xf32>
    %13 = vector.multi_reduction <maximumf>, %8, %cst_7 [1] : vector<1x256xf32> to vector<1xf32>
    %14 = vector.shape_cast %13 : vector<1xf32> to vector<1x1xf32>
    %15 = arith.addf %12, %14 : vector<1x1xf32>
    %16 = vector.broadcast %15 : vector<1x1xf32> to vector<1x256xf32>
    %17 = arith.mulf %8, %16 : vector<1x256xf32>
    %18 = vector.broadcast %17 : vector<1x256xf32> to vector<4x256xf32>
    %19 = arith.mulf %1, %18 : vector<4x256xf32>
    %c0_8 = arith.constant 0 : index
    %c0_9 = arith.constant 0 : index
    %c0_10 = arith.constant 0 : index
    %20 = vector.load %arg3[%c0_8, %c0_9, %c0_10] : memref<1x4x256xf32, #tpu.memory_space<vmem>>, vector<1x4x256xf32>
    %21 = vector.shape_cast %20 : vector<1x4x256xf32> to vector<4x256xf32>
    %22 = vector.shape_cast %19 : vector<4x256xf32> to vector<1x4x256xf32>
    tpu.vector_store %arg3[%c0_8, %c0_9, %c0_10], %22 {strides = array<i32>} : memref<1x4x256xf32, #tpu.memory_space<vmem>>, vector<1x4x256xf32>,
    return
  }
  func.func @transform_0(%arg0: i32) -> (i32, i32) {
    %c0_i32 = arith.constant 0 : i32
    %c0_i32_0 = arith.constant 0 : i32
    %c0_i32_1 = arith.constant 0 : i32
    return %c0_i32, %c0_i32_0 : i32, i32
  }
  func.func @transform_1(%arg0: i32) -> (i32, i32, i32) {
    %c0_i32 = arith.constant 0 : i32
    %c0_i32_0 = arith.constant 0 : i32
    %c0_i32_1 = arith.constant 0 : i32
    return %arg0, %c0_i32, %c0_i32_0 : i32, i32, i32
  }
  func.func @transform_2(%arg0: i32) -> (i32, i32, i32) {
    %c0_i32 = arith.constant 0 : i32
    %c0_i32_0 = arith.constant 0 : i32
    %c0_i32_1 = arith.constant 0 : i32
    return %arg0, %c0_i32, %c0_i32_0 : i32, i32, i32
  }
}

</mosaic_0001>

<bundles_post_ra>
// kernel: tpu_custom_call.1
= control target key start
LH: loop header
LB: loop body
LE: loop exit
PB: predicated region body
PF: predicated region fallthrough
CT: control target
= control target key end

     0   :  { %7 = vsyncpa [#allocation3], 0  ;;  %s1246_s0 = inlined_call_operand.hbm [shape: f32[1,4], index: 0, kind: input, shape index: {}]   ;;  %s1247_s1 = inlined_call_operand.hbm [shape: f32[2,4,256], index: 1, kind: input, shape index: {}]   ;;  %s1248_s2 = inlined_call_operand.hbm [shape: f32[2,4,256], index: 2, kind: output, shape index: {}]  }
   0x1   :  { %8 = vsyncpa [#allocation6], 0 }
   0x2   :  { %10 = vsyncpa [#allocation6 + $0x1], 0 }
   0x3   :  { %11 = vsyncpa [#allocation4], 0 }
   0x4   :  { %13 = vsyncpa [#allocation4 + $0x1], 0  ;;  %s1035_s9 = smov 0   ;;  %s1037_s10 = smov 0  }
   0x5   :  { %s1039_s11 = smov 0   ;;  %s1041_s12 = smov 0  }
   0x6 LB: > { %s1056_s13 = sadd.s32 4294967295, %s1014_s12   ;;  %s789_s14 = sadd.s32 4294967294, %s1014_s12   ;;  %s1014_s12 = sphi %s1041_s12, %s1272_s12   ;;  %s1010_s11 = sphi %s1039_s11, %s1271_s11   ;;  %s1006_s10 = sphi %s1037_s10, %s1270_s10   ;;  %s1002_s9 = sphi %s1035_s9, %s1269_s9  }
   0x7   : > { %p60_p0 = scmp.ne.s32.totalorder %s1006_s10, %s1002_s9  ;;  %p1249_p1 = scmp.eq.s32.totalorder %s1056_s13, 0 }
   0x8   : > { %p90_p3 = scmp.eq.s32.totalorder %s789_s14, 1  ;;  %p790_p5 = scmp.ge.s32.totalorder %s1014_s12, 1 }
   0x9   : > { %p1065_p4 = por %p1249_p1, %p60_p0  ;;  %p97_p7 = scmp.lt.s32.totalorder %s1014_s12, 3 }
   0xa   : > { %p1070_p6 = por %p90_p3, %p60_p0  ;;  %s1016_s18 = smov [#allocation2]  }
   0xb   : > { %s1252_s15 = scalar_select %p1065_p4, 1, 0 }
   0xc   : > { %s1253_s16 = scalar_select %p1070_p6, 1, 0 }
   0xd   : > { %p1075_p8 = pnand %p790_p5, %p97_p7  ;;  %s110_s19 = sshll.u32 %s1016_s18, 4  ;;  %s111_s19 = int_to_ptr.vmem [resolvable:$true] %s110_s19 }
   0xe   : > { %s1083_s20 = sadd.s32 1, %s1014_s12   ;;  %s47_s24 = sadd.s32 1, %s1010_s11 }
   0xf   : > { %s1254_s17 = scalar_select %p1075_p8, 1, 0 }
  0x10   : > { %p827_p10 = pneg %p1075_p8  ;;  %s44_s22 = ssub.s32 %s1014_s12, %s1083_s20 }
  0x11   : > { %p1093_p12 = scmp.eq.s32.totalorder %s44_s22, 0  ;;  %s886_s27 = scalar_lea.hbm %s1246_s0, 16 }
  0x12   : > { %p1087_p11 = pnand %p827_p10, %p1249_p1  ;;  %p887_p0 = scmp.ne.s32.totalorder %s1246_s0, %s886_s27 }
  0x13   : > { %s1256_s23 = scalar_select %p1093_p12, 1, 0 }
  0x14   : > { %p888_p3 = pneg %p1087_p11  ;;  %p893_p10 = scmp.lt.u32.totalorder %s886_s27, %s1246_s0 }
  0x16   : > { %p889_p5 = pnand %p888_p3, %p887_p0 }
  0x18   : > { %p890_p7 = pneg %p889_p5 }
  0x1a   : > { %p895_p9 = pnand %p893_p10, %p890_p7 }
  0x1c   : > { %898 = shalt.err (!%p895_p9)
}
  0x1d   : > { %s899_s4 = scalar_lea.vmem %s111_s19, 16  ;;  %s906_s5 = scalar_lea.vmem %s111_s19, 32 }
  0x1e   : > { %p900_p1 = scmp.ne.s32.totalorder %s111_s19, %s899_s4  ;;  %p907_p6 = scmp.lt.s32.totalorder %s111_s19, %s111_s19 }
  0x1f   : > { %p908_p4 = scmp.lt.s32.totalorder %s906_s5, %s899_s4 }
  0x20   : > { %p902_p2 = pnand %p900_p1, %p888_p3 }
  0x21   : > { %p909_p8 = por %p908_p4, %p907_p6 }
  0x22   : > { %p903_p13 = pneg %p902_p2 }
  0x24   : > { %p910_p12 = pnand %p909_p8, %p903_p13 }
  0x26   : > { %913 = shalt.err (!%p910_p12)
}
  0x27   : > { %830 = dma.hbm_to_vmem [thread:$0]  (!%p1087_p11), %s1246_s0, 16, %s111_s19, [#allocation3]  }
  0x28   : > { %p1257_p1 = scmp.ne.s32.totalorder %s1256_s23, 0  ;;  %p55_p2 = scmp.eq.s32.totalorder %s1014_s12, 0 }
  0x29   : > { %p1258_p4 = scmp.ne.s32.totalorder %s1010_s11, %s1006_s10  ;;  %p1259_p6 = scmp.eq.s32.totalorder %s1056_s13, 1 }
  0x2a   : > { %s1119_s8 = scalar_select %p1257_p1, %s1010_s11, %s47_s24  }
  0x2b   : > { %p1127_p8 = por %p1259_p6, %p1258_p4  ;;  %p840_p9 = scmp.lt.s32.totalorder %s1014_s12, 2 }
  0x2c   : > { %s121_s18 = sand.u32 1, %s1010_s11   ;;  %p1261_p12 = pmov %p1258_p4 }
  0x2d   : > { %s793_s21 = sshll.u32 %s121_s18, 3  ;;  %s807_s22 = sshll.u32 %s1014_s12, 7 }
  0x2e   : > { %p56_p13 = por %p55_p2, %p1261_p12  ;;  %s1140_s19 = scalar_lea.hbm %s1247_s1, %s807_s22 }
  0x2f   : > { %s125_s23 = scalar_lea.vmem [#allocation5], %s793_s21  ;;  %s122_s28 = scalar_lea.sflag [#allocation6], %s121_s18 }
  0x30   : > { %s133_s24 = sshll.u32 %s125_s23, 4  ;;  %p1142_p11 = pnand %p840_p9, %p56_p13  ;;  %s1146_s24 = int_to_ptr.vmem [resolvable:$true] %s133_s24 }
  0x31   : > { %s914_s29 = scalar_lea.hbm %s1140_s19, 128  ;;  %s919_s4 = scalar_lea.hbm %s1247_s1, 256 }
  0x32   : > { %p915_p0 = scmp.ne.s32.totalorder %s1140_s19, %s914_s29  ;;  %p916_p3 = pneg %p1142_p11 }
  0x33   : > { %p920_p10 = scmp.lt.u32.totalorder %s1140_s19, %s1247_s1  ;;  %p921_p1 = scmp.lt.u32.totalorder %s919_s4, %s914_s29 }
  0x34   : > { %p917_p5 = pnand %p916_p3, %p915_p0  ;;  %p923_p4 = scmp.lt.u32.totalorder %s914_s29, %s1140_s19 }
  0x35   : > { %p922_p2 = por %p921_p1, %p920_p10 }
  0x36   : > { %p918_p7 = pneg %p917_p5 }
  0x37   : > { %p924_p6 = por %p923_p4, %p922_p2 }
  0x39   : > { %p925_p9 = pnand %p924_p6, %p918_p7 }
  0x3b   : > { %928 = shalt.err (!%p925_p9)
}
  0x3c   : > { %s929_s7 = scalar_lea.vmem %s1146_s24, 128  ;;  %s1017_s18 = smov [#allocation5]  }
  0x3d   : > { %p930_p12 = scmp.ne.s32.totalorder %s1146_s24, %s929_s7  ;;  %s934_s21 = sshll.u32 %s1017_s18, 4  ;;  %s935_s21 = int_to_ptr.vmem [resolvable:$false] %s934_s21 }
  0x3e   : > { %s936_s22 = scalar_lea.vmem %s935_s21, 256  ;;  %p937_p5 = scmp.lt.s32.totalorder %s1146_s24, %s935_s21 }
  0x3f   : > { %p932_p13 = pnand %p930_p12, %p916_p3  ;;  %p938_p10 = scmp.lt.s32.totalorder %s936_s22, %s929_s7 }
  0x41   : > { %p933_p0 = pneg %p932_p13  ;;  %p939_p1 = por %p938_p10, %p937_p5 }
  0x43   : > { %p940_p2 = pnand %p939_p1, %p933_p0 }
  0x45   : > { %943 = shalt.err (!%p940_p2)
}
  0x46   : > { %834 = dma.hbm_to_vmem [thread:$0]  (!%p1142_p11), %s1140_s19, 128, %s1146_s24, %s122_s28  }
  0x47   : > { %p1263_p7 = scmp.ne.s32.totalorder %s1254_s17, 0 }
  0x48   : > { %p1264_p3 = scmp.eq.s32.totalorder (!%p1263_p7), %s1056_s13, 0 }
  0x49   : > { %142 = sbr.rel (%p1263_p7) target bundleno = 528 (0x210), region = 28 }
  0x50   : > { %989 = dma.done.wait (%p1264_p3), [#allocation3], 16   ;;  %p1265_p4 = pmov %p1264_p3 }
  0x51   : > { %s1180_s25 = sand.u32 1, %s1006_s10   ;;  %p1266_p11 = scmp.ne.s32.totalorder %s1252_s15, 0 }
  0x52   : > { %991 = vsyncadd (%p1265_p4), [#allocation3], 4294967280  ;;  %s798_s26 = sshll.u32 %s1180_s25, 3  ;;  %s149_s23 = scalar_lea.sflag [#allocation6], %s1180_s25 }
  0x53   : > { %s152_s19 = scalar_lea.vmem [#allocation5], %s798_s26 }
  0x54   : > { %993 = dma.done.wait (%p1266_p11), %s149_s23, 128  }
  0x55   : > { %995 = vsyncadd (%p1266_p11), %s149_s23, 4294967168  ;;  %v1018_v0 = vmov 0.0   ;;  %vm181_vm0 = vcmask 1043456   ;;  %vm177_vm1 = vcmask 31744   ;;  %v1190_v1 = vld [vmem:[%s152_s19] sm:$0xff]  ;;  %vm663_vm2 = vcmask 1040384  }
  0x56   : > { %489 = vmatprep.mubr.f32.mxu0 %v1018_v0  ;;  %252 = vmatprep.mubr.f32.mxu1 %v1018_v0  ;;  %v174_v2 = vld [vmem:[#allocation2] sm:$0x1]  ;;  %v176_v3 = vcombine.high %v1190_v1, %v1190_v1  ;;  %v182_v4 = vsel %vm181_vm0, %v1190_v1, 0  ;;  %v678_v42 = vlaneseq  ;;  %s808_s15 = sshll.u32 %s1056_s13, 7  ;;  %s172_s17 = scalar_lea.vmem [#allocation7], %s798_s26 }
  0x57   : > { %v179_v5 = vsel %vm177_vm1, %v174_v2, 0  ;;  %v188_v6 = vand.u32 4294901760, %v182_v4  ;;  %s707_s24 = sshll.u32 %s172_s17, 4  ;;  %s1202_s29 = scalar_lea.hbm %s1248_s2, %s808_s15  ;;  %s1204_s24 = int_to_ptr.vmem [resolvable:$true] %s707_s24 }
  0x58   : > { %v253_v7 = vand.u32 4294901760, %v179_v5  ;;  %v184_v8 = vsel %vm181_vm0, %v176_v3, 0  ;;  %v679_v44 = vshrl.u32 %v678_v42, 7  ;;  %s693_s30 = scalar_lea.sflag [#allocation4], %s1180_s25  ;;  %s944_s3 = scalar_lea.vmem %s1204_s24, 128 }
  0x59   : > { %v186_v9 = vand.u32 4294901760, %v184_v8  ;;  %v271_v10 = vsub.f32 %v182_v4, %v188_v6  ;;  %p945_p6 = scmp.ne.s32.totalorder %s1204_s24, %s944_s3  ;;  %s1019_s13 = smov [#allocation7]  }
  0x5a   : > { %v254_v11 = vsub.f32 %v179_v5, %v253_v7  ;;  %v680_v47 = vsub.s32 0, %v679_v44  ;;  %s948_s4 = sshll.u32 %s1019_s13, 4  ;;  %s949_s4 = int_to_ptr.vmem [resolvable:$false] %s948_s4 }
  0x5b   : > { %424 = vmatprep.subr.mxu0 %v186_v9  ;;  %187 = vmatprep.subr.mxu1 %v186_v9  ;;  %v265_v13 = vsub.f32 %v184_v8, %v186_v9  ;;  %v272_v14 = vand.u32 4294901760, %v271_v10  ;;  %p946_p9 = pnand %p945_p6, %p1127_p8  ;;  %s950_s5 = scalar_lea.vmem %s949_s4, 256 }
  0x5c   : > { %v255_v12 = vand.u32 4294901760, %v254_v11  ;;  %426 = vmatpush1.msra.mxu0 %v188_v6  ;;  %189 = vmatpush1.msra.mxu1 %v188_v6  ;;  %p951_p13 = scmp.lt.s32.totalorder %s1204_s24, %s949_s4  ;;  %p952_p0 = scmp.lt.s32.totalorder %s950_s5, %s944_s3 }
  0x5d   : > { %v266_v16 = vand.u32 4294901760, %v265_v13  ;;  %v273_v17 = vsub.f32 %v271_v10, %v272_v14  ;;  %p947_p12 = pneg %p946_p9 }
  0x5e   : > { %493 = vmatmul.mubr.f32.vlgmr.msra.gmra.mrb[0].mxu0 %v255_v12  ;;  %v256_v15 = vsub.f32 %v254_v11, %v255_v12  ;;  %p953_p5 = por %p952_p0, %p951_p13 }
  0x5f   : > { %569 = vmatprep.mubr.f32.mxu0 %v1018_v0  ;;  %v267_v19 = vsub.f32 %v265_v13, %v266_v16  ;;  %502 = vmatprep.subr.mxu0 %v266_v16  ;;  %v274_v20 = vand.u32 4294901760, %v273_v17 }
  0x60   : > { %v257_v18 = vand.u32 4294901760, %v256_v15  ;;  %506 = vmatpush1.msra.mxu0 %v272_v14  ;;  %p954_p10 = pnand %p953_p5, %p947_p12 }
  0x61   : > { %v268_v21 = vand.u32 4294901760, %v267_v19  ;;  %578 = vmatprep.subr.mxu0 %v186_v9 }
  0x62   : > { %258 = vmatmul.mubr.f32.vlgmr.msra.gmra.mrb[0].mxu1 %v257_v18 }
  0x63   : > { %338 = vmatprep.mubr.f32.mxu1 %v1018_v0  ;;  %269 = vmatprep.subr.mxu1 %v268_v21 }
  0x64   : > { %275 = vmatpush1.msra.mxu1 %v274_v20 }
  0x65   : > { %348 = vmatprep.subr.mxu1 %v265_v13 }
  0x66   : > { %571 = vmatmul.mubr.f32.vlgmr.msra.gmra.mrb[0].mxu0 %v253_v7 }
  0x67   : > { %580 = vmatpush1.msra.mxu0 %v188_v6  ;;  %643 = vmatprep.mubr.f32.mxu0 %v1018_v0 }
  0x6a   : > { %340 = vmatmul.mubr.f32.vlgmr.msra.gmra.mrb[0].mxu1 %v253_v7 }
  0x6b   : > { %351 = vmatpush1.msra.mxu1 %v271_v10  ;;  %414 = vmatprep.mubr.f32.mxu1 %v1018_v0 }
  0x6e   : > { %645 = vmatmul.mubr.f32.vlgmr.msra.gmra.mrb[0].mxu0 %v253_v7 }
  0x72   : > { %417 = vmatmul.mubr.f32.vlgmr.msra.gmra.mrb[0].mxu1 %v254_v11 }
 0x141   : > { %v646_v22 = vpop.f32.mrb[0].mxu0 }
 0x142   : > { %v648_v23 = vpop.f32.mrb[1].mxu0 }
 0x145   : > { %v418_v24 = vpop.f32.mrb[0].mxu1 }
 0x146   : > { %v809_v25 = vadd.f32 %v646_v22, %v418_v24  ;;  %v420_v26 = vpop.f32.mrb[1].mxu1 }
 0x147   : > { %v810_v27 = vadd.f32 %v648_v23, %v420_v26 }
 0x148   : > { %v800_v28 = vmul.f32 -1.442695, %v809_v25 }
 0x149   : > { %v801_v29 = vmul.f32 -1.442695, %v810_v27 }
 0x14a   : > { %878 = vpow2.f32 %v800_v28 }
 0x14b   : > { %880 = vpow2.f32 %v801_v29 }
 0x154   : > { %v879_v30 = vpop.eup %878 }
 0x155   : > { %v881_v31 = vpop.eup %880  ;;  %v657_v32 = vadd.f32 1.0, %v879_v30 }
 0x156   : > { %v658_v33 = vadd.f32 1.0, %v881_v31 }
 0x157   : > { %882 = vrcp.f32 %v657_v32 }
 0x158   : > { %884 = vrcp.f32 %v658_v33 }
 0x161   : > { %v883_v34 = vpop.eup %882 }
 0x162   : > { %v885_v35 = vpop.eup %884  ;;  %v664_v36 = vsel %vm663_vm2, %v883_v34, 0.0  ;;  %v670_v39 = vsel %vm663_vm2, %v883_v34, -inf }
 0x163   : > { %v665_v37 = vsel %vm663_vm2, %v885_v35, 0.0  ;;  %v671_v40 = vsel %vm663_vm2, %v885_v35, -inf }
 0x164   : > { %v666_v38 = vadd.f32 %v665_v37, %v664_v36  ;;  %v672_v41 = vmax.f32 %v670_v39, %v671_v40 }
 0x166   : > { %667 = vadd.xlane.f32.xlu0 %v666_v38 }
 0x16a   : > { %673 = vmax.xlane.f32.xlu0 %v672_v41 }
 0x1f3   : > { %v668_v43 = vpop.xlane.xlu0 %667 }
 0x1f4   : > { %v669_v45 = vmul.f32 0.00390625, %v668_v43 }
 0x1f7   : > { %v674_v46 = vpop.xlane.xlu0 %673 }
 0x1f8   : > { %v675_v48 = vadd.f32 %v674_v46, %v669_v45 }
 0x1fa   : > { %v676_v49 = vmul.f32 %v883_v34, %v675_v48  ;;  %v677_v50 = vmul.f32 %v885_v35, %v675_v48 }
 0x1fc   : > { %v681_v51 = vrot.slane %v676_v49, %v680_v47  ;;  %v685_v52 = vrot.slane %v677_v50, %v680_v47 }
 0x1fe   : > { %v688_v53 = vcombine.low %v681_v51, %v685_v52 }
 0x200   : > { %v690_v54 = vmul.f32 %v688_v53, %v1190_v1 }
 0x202   : > { %691 = vst [vmem:[%s172_s17] sm:$0xff] %v690_v54 }
 0x203   : > { %957 = shalt.err (!%p954_p10)
}
 0x204   : > { %s958_s6 = scalar_lea.hbm %s1202_s29, 128  ;;  %s962_s21 = scalar_lea.hbm %s1248_s2, 256 }
 0x205   : > { %p959_p1 = scmp.ne.s32.totalorder %s1202_s29, %s958_s6  ;;  %p963_p3 = scmp.lt.u32.totalorder %s1202_s29, %s1248_s2 }
 0x206   : > { %p964_p4 = scmp.lt.u32.totalorder %s962_s21, %s958_s6  ;;  %p966_p6 = scmp.lt.u32.totalorder %s958_s6, %s1202_s29 }
 0x207   : > { %p960_p2 = pnand %p959_p1, %p1127_p8 }
 0x208   : > { %p965_p11 = por %p964_p4, %p963_p3 }
 0x209   : > { %p961_p7 = pneg %p960_p2 }
 0x20a   : > { %p967_p9 = por %p966_p6, %p965_p11 }
 0x20c   : > { %p968_p12 = pnand %p967_p9, %p961_p7 }
 0x20e   : > { %971 = shalt.err (!%p968_p12)
}
 0x20f   : > { %825 = dma.vmem_to_hbm [thread:$0]  (%p1127_p8), %s1204_s24, 128, %s1202_s29, %s693_s30  }
 0x210 PF: > { %s719_s26 = sand.u32 1, %s1002_s9   ;;  %p1267_p13 = scmp.ne.s32.totalorder %s1253_s16, 0 }
 0x211   : > { %p1268_p0 = scmp.ge.s32.totalorder %s1014_s12, 2  ;;  %s720_s23 = scalar_lea.sflag [#allocation4], %s719_s26 }
 0x213   : > { %p836_p5 = pnand %p1268_p0, %p1267_p13 }
 0x215   : > { %997 = dma.done.wait (!%p836_p5), %s720_s23, 128  }
 0x216   : > { %999 = vsyncadd (!%p836_p5), %s720_s23, 4294967168  ;;  %p16_p10 = scmp.ge.s32.totalorder %s1083_s20, 4   ;;  %s1269_s9 = smov %s1006_s10 }
 0x217   : > { %s1270_s10 = smov %s1010_s11  ;;  %s1271_s11 = smov %s1119_s8 }
 0x218   : > { %s1272_s12 = smov %s1083_s20  ;;  %18 = sbr.rel (!%p16_p10) target bundleno = 6 (0x6), region = 78 }
 0x21f   :  { %725 = vsyncpa [#allocation3], 1 }
 0x220   :  { %727 = vsyncpa [#allocation3 + $0x1], 1 }
 0x221   :  { %728 = vsyncpa [#allocation6], 1 }
 0x222   :  { %730 = vsyncpa [#allocation6 + $0x1], 1 }
 0x223   :  { %731 = vsyncpa [#allocation4], 1 }
 0x224   :  { %733 = vsyncpa [#allocation4 + $0x1], 1 }

</bundles_post_ra>
